<compile_context>
chip_gen: v5e
topology: v5e:2x2
jax: 0.10.0
libtpu: 0.0.40
codegen_flags: <defaults>
</compile_context>

<pallas_src>
import functools

import jax
import jax.numpy as jnp
from jax import lax
from jax.experimental import pallas as pl
from jax.experimental.pallas import tpu as pltpu

_LANES_BIG = 512       # lane width for large N (multiple of 128 -> unmasked vst)
_LANES_SMALL = 128     # lane width for small N (less padding waste)
_SMALL_N = 4096        # below this, use the small lane width
_MAX_TILE_ROWS = 512   # sublane rows per grid step (multiple of 8)


# --------------------------------------------------------------------------- #
# Kernel bodies
# --------------------------------------------------------------------------- #
def _per_tile_loss(pred_ref, tgt_ref, *, weight_bbox, weight_theta, eps):
    """Weighted EAST loss for one (5, TR, C) SoA tile -> (TR, C) f32."""
    f32 = jnp.float32

    def axis_terms(p_c, p_s, g_c, g_s):
        # One spatial axis: pred/gt extents, intersection extent, enclosure extent.
        p0 = p_c - 0.5 * p_s
        p1 = p_c + 0.5 * p_s
        g0 = g_c - 0.5 * g_s
        g1 = g_c + 0.5 * g_s
        inter = jnp.maximum(jnp.minimum(g1, p1) - jnp.maximum(g0, p0) + 1.0, 0.0)
        enclose = jnp.maximum(jnp.maximum(g1, p1) - jnp.minimum(g0, p0) + 1.0, 0.0)
        return p1 - p0, g1 - g0, inter, enclose

    # x-axis first; its corner temporaries retire before the y-axis loads,
    # keeping the live (TR, C) value count low (fewer vreg spills).
    pw, gw, wi, we = axis_terms(pred_ref[0].astype(f32), pred_ref[2].astype(f32),
                                tgt_ref[0].astype(f32), tgt_ref[2].astype(f32))
    ph, gh, hi, he = axis_terms(pred_ref[1].astype(f32), pred_ref[3].astype(f32),
                                tgt_ref[1].astype(f32), tgt_ref[3].astype(f32))

    inter = wi * hi
    union = gw * gh + pw * ph - inter
    enclosure = we * he
    # 1 - giou == 1 - iou + (enclosure - union)/enclosure == 2 - iou - union/enclosure
    loss_bbox = 2.0 - inter / union - union / enclosure

    # Theta planes loaded last (after the bbox algebra's live set has shrunk).
    d_theta = pred_ref[4].astype(f32) - tgt_ref[4].astype(f32)
    loss_theta = 1.0 - jnp.cos(d_theta + eps)

    return weight_theta * loss_theta + weight_bbox * loss_bbox


def _east_loss_kernel(pred_ref, tgt_ref, out_ref, *, weight_bbox, weight_theta, eps):
    """reduction='none': write the full (TR, C) weighted-loss plane."""
    loss = _per_tile_loss(pred_ref, tgt_ref, weight_bbox=weight_bbox,
                          weight_theta=weight_theta, eps=eps)
    out_ref[...] = loss.astype(out_ref.dtype)


def _east_loss_sum_kernel(pred_ref, tgt_ref, acc_ref, *, weight_bbox, weight_theta,
                          eps, n, tile_rows, lanes):
    """reduction='sum'/'mean': accumulate a masked per-tile partial sum."""
    @pl.when(pl.program_id(0) == 0)
    def _():
        acc_ref[...] = jnp.zeros_like(acc_ref)

    loss = _per_tile_loss(pred_ref, tgt_ref, weight_bbox=weight_bbox,
                          weight_theta=weight_theta, eps=eps)

    # Mask padded boxes (global box index >= n) before accumulating.
    row = lax.broadcasted_iota(jnp.int32, loss.shape, 0)
    lane = lax.broadcasted_iota(jnp.int32, loss.shape, 1)
    gidx = (pl.program_id(0) * tile_rows + row) * lanes + lane
    masked = jnp.where(gidx < n, loss, 0.0)

    # Two single-axis keepdims reductions: (TR, C) -> (1, C) -> (1, 1).
    partial = jnp.sum(jnp.sum(masked, axis=0, keepdims=True), axis=1, keepdims=True)
    acc_ref[...] = acc_ref[...] + partial


# --------------------------------------------------------------------------- #
# Wrapper
# --------------------------------------------------------------------------- #
def east_loss(pred_rbox, tgt_rbox, *, weight_bbox=1.0, weight_theta=1.0,
              eps=1e-10, reduction="none"):
    """Pallas implementation of EastLoss.forward."""
    assert pred_rbox.shape[-1] == 5 and tgt_rbox.shape[-1] == 5
    assert reduction in ("none", "mean", "sum")
    n = int(pred_rbox.shape[0])
    assert n > 0

    # ---- streaming dtype: keep narrow inputs narrow, upcast in-kernel -------
    allowed = (jnp.dtype(jnp.bfloat16), jnp.dtype(jnp.float16), jnp.dtype(jnp.float32))
    if pred_rbox.dtype == tgt_rbox.dtype and jnp.dtype(pred_rbox.dtype) in allowed:
        stream_dtype = jnp.dtype(pred_rbox.dtype)
    else:
        stream_dtype = jnp.dtype(jnp.float32)
    out_dtype = stream_dtype

    # ---- lane-dense SoA tiling (all Python-int/static) ----------------------
    c = _LANES_SMALL if n <= _SMALL_N else _LANES_BIG
    rows_needed = max(pl.cdiv(n, c), 1)
    rows_needed = pl.cdiv(rows_needed, 8) * 8            # multiple of 8 sublanes
    if rows_needed <= _MAX_TILE_ROWS:
        if rows_needed >= 16:
            # Split the single tile so both v7x TensorCores get work.
            tr = max(8, ((rows_needed // 2) // 8) * 8)
        else:
            tr = rows_needed
    else:
        tr = _MAX_TILE_ROWS
    r_total = pl.cdiv(rows_needed, tr) * tr              # grid divides evenly
    n_pad = r_total * c
    num_tiles = r_total // tr

    def to_soa(x):
        x = x.astype(stream_dtype)
        # Zero-padded rows are harmless: union=-1, enclosure=1 -> finite values
        # that are sliced off ('none') or masked out ('sum'/'mean').
        x = jnp.pad(x, ((0, n_pad - n), (0, 0)))
        return x.T.reshape(5, r_total, c)                # [5, R, C]

    pred_soa = to_soa(pred_rbox)
    tgt_soa = to_soa(tgt_rbox)

    # ---- VMEM budget: double-buffered inputs + output, capped at 30 MiB -----
    in_block = 5 * tr * c * stream_dtype.itemsize
    out_block = tr * c * jnp.dtype(out_dtype).itemsize
    vmem_need = 2 * 2 * in_block + 2 * out_block
    vmem_limit = int(min(max(vmem_need + (4 << 20), 16 << 20), 30 << 20))

    common = dict(weight_bbox=float(weight_bbox),
                  weight_theta=float(weight_theta),
                  eps=float(eps))
    in_specs = [
        pl.BlockSpec((5, tr, c), lambda i: (0, i, 0)),
        pl.BlockSpec((5, tr, c), lambda i: (0, i, 0)),
    ]

    if reduction == "none":
        kernel = functools.partial(_east_loss_kernel, **common)
        loss_planes = pl.pallas_call(
            kernel,
            out_shape=jax.ShapeDtypeStruct((r_total, c), out_dtype),
            grid=(num_tiles,),
            in_specs=in_specs,
            out_specs=pl.BlockSpec((tr, c), lambda i: (i, 0)),
            compiler_params=pltpu.CompilerParams(
                dimension_semantics=("parallel",),
                vmem_limit_bytes=vmem_limit),
        )(pred_soa, tgt_soa)
        return loss_planes.reshape(n_pad)[:n][:, None]   # back to [N, 1]

    # reduction == 'sum' / 'mean': fused in-kernel reduction (no plane writeback).
    kernel = functools.partial(_east_loss_sum_kernel, n=n, tile_rows=tr, lanes=c,
                               **common)
    total = pl.pallas_call(
        kernel,
        out_shape=jax.ShapeDtypeStruct((1, 1), jnp.float32),
        grid=(num_tiles,),
        in_specs=in_specs,
        out_specs=pl.BlockSpec((1, 1), lambda i: (0, 0)),
        compiler_params=pltpu.CompilerParams(
            dimension_semantics=("arbitrary",),
            vmem_limit_bytes=vmem_limit),
    )(pred_soa, tgt_soa)[0, 0]

    if reduction == "mean":
        total = total / n
    return total.astype(out_dtype)


# --------------------------------------------------------------------------- #
# Plain-JAX reference (mirrors the PyTorch module, reduction='none')
# --------------------------------------------------------------------------- #
def _east_loss_ref(pred_rbox, tgt_rbox, weight_bbox=1.0, weight_theta=1.0, eps=1e-10):
    loss_theta = 1.0 - jnp.cos(pred_rbox[:, 4:5] - tgt_rbox[:, 4:5] + eps)

    def to_xyxy(b):
        cx, cy, w, h = b[:, 0], b[:, 1], b[:, 2], b[:, 3]
        return jnp.stack([cx - 0.5 * w, cy - 0.5 * h, cx + 0.5 * w, cy + 0.5 * h], -1)

    gt, pr = to_xyxy(tgt_rbox[:, :4]), to_xyxy(pred_rbox[:, :4])
    gt_area = (gt[:, 2] - gt[:, 0]) * (gt[:, 3] - gt[:, 1])
    pr_area = (pr[:, 2] - pr[:, 0]) * (pr[:, 3] - pr[:, 1])
    lt = jnp.maximum(gt[:, :2], pr[:, :2])
    rb = jnp.minimum(gt[:, 2:], pr[:, 2:])
    wh = jnp.clip(rb - lt + 1.0, 0.0)
    inter = wh[:, 0] * wh[:, 1]
    union = gt_area + pr_area - inter
    iou = inter / union
    lt = jnp.minimum(gt[:, :2], pr[:, :2])
    rb = jnp.maximum(gt[:, 2:], pr[:, 2:])
    wh = jnp.clip(rb - lt + 1.0, 0.0)
    enclosure = wh[:, 0] * wh[:, 1]
    giou = iou - (enclosure - union) / enclosure
    loss_bbox = (1.0 - giou)[:, None]
    return weight_theta * loss_theta + weight_bbox * loss_bbox


if __name__ == "__main__":
    key = jax.random.PRNGKey(0)

    def make_boxes(k, m):
        k1, k2, k3 = jax.random.split(k, 3)
        cxy = jax.random.uniform(k1, (m, 2), minval=20.0, maxval=80.0)
        wh = jax.random.uniform(k2, (m, 2), minval=10.0, maxval=40.0)
        th = jax.random.uniform(k3, (m, 1), minval=-0.7, maxval=0.7)
        return jnp.concatenate([cxy, wh, th], axis=-1)  # [m, 5]

    # --- small case (single tile) --------------------------------------------
    N = 8
    kp, kt, kp2, kt2 = jax.random.split(key, 4)
    pred_rbox = make_boxes(kp, N)
    tgt_rbox = make_boxes(kt, N)

    loss = east_loss(pred_rbox, tgt_rbox)                # reduction='none' -> [N, 1]
    jax.block_until_ready(loss)

    ref = _east_loss_ref(pred_rbox, tgt_rbox)
    assert loss.shape == (N, 1)
    assert jnp.allclose(loss, ref, atol=1e-5, rtol=1e-5), (loss, ref)
    assert jnp.allclose(east_loss(pred_rbox, tgt_rbox, reduction="sum"),
                        ref.sum(), atol=1e-4, rtol=1e-5)
    assert jnp.allclose(east_loss(pred_rbox, tgt_rbox, reduction="mean"),
                        ref.mean(), atol=1e-5, rtol=1e-5)

    # --- larger case (multi-tile grid + masked in-kernel reduction) ----------
    N2 = 5000
    pred2 = make_boxes(kp2, N2)
    tgt2 = make_boxes(kt2, N2)
    loss2 = east_loss(pred2, tgt2)
    jax.block_until_ready(loss2)
    ref2 = _east_loss_ref(pred2, tgt2)
    assert loss2.shape == (N2, 1)
    assert jnp.allclose(loss2, ref2, atol=1e-5, rtol=1e-5)
    assert jnp.allclose(east_loss(pred2, tgt2, reduction="sum"),
                        ref2.sum(), atol=1e-2, rtol=1e-5)
    assert jnp.allclose(east_loss(pred2, tgt2, reduction="mean"),
                        ref2.mean(), atol=1e-5, rtol=1e-5)

    print("KERNEL_OK")
</pallas_src>

<mosaic_0001>
module attributes {stable_mosaic.version = 11 : i64} {
  func.func @_east_loss_kernel(%arg0: i32, %arg1: memref<5x8x128xf32, #tpu.memory_space<vmem>>, %arg2: memref<5x8x128xf32, #tpu.memory_space<vmem>>, %arg3: memref<8x128xf32, #tpu.memory_space<vmem>>) attributes {dimension_semantics = [#tpu.dimension_semantics<parallel>], iteration_bounds = array<i64: 1>, scalar_prefetch = 0 : i64, scratch_operands = 0 : i64, tpu.core_type = #tpu.core_type<tc>, window_params = [{transform_indices = @transform_0, window_bounds = array<i64: 5, 8, 128>}, {transform_indices = @transform_1, window_bounds = array<i64: 5, 8, 128>}, {transform_indices = @transform_2, window_bounds = array<i64: 8, 128>}]} {
    %c0 = arith.constant 0 : index
    %c0_0 = arith.constant 0 : index
    %c0_1 = arith.constant 0 : index
    %0 = vector.load %arg1[%c0, %c0_0, %c0_1] : memref<5x8x128xf32, #tpu.memory_space<vmem>>, vector<1x8x128xf32>
    %1 = vector.shape_cast %0 : vector<1x8x128xf32> to vector<8x128xf32>
    %c2 = arith.constant 2 : index
    %c0_2 = arith.constant 0 : index
    %c0_3 = arith.constant 0 : index
    %2 = vector.load %arg1[%c2, %c0_2, %c0_3] : memref<5x8x128xf32, #tpu.memory_space<vmem>>, vector<1x8x128xf32>
    %3 = vector.shape_cast %2 : vector<1x8x128xf32> to vector<8x128xf32>
    %c0_4 = arith.constant 0 : index
    %c0_5 = arith.constant 0 : index
    %c0_6 = arith.constant 0 : index
    %4 = vector.load %arg2[%c0_4, %c0_5, %c0_6] : memref<5x8x128xf32, #tpu.memory_space<vmem>>, vector<1x8x128xf32>
    %5 = vector.shape_cast %4 : vector<1x8x128xf32> to vector<8x128xf32>
    %c2_7 = arith.constant 2 : index
    %c0_8 = arith.constant 0 : index
    %c0_9 = arith.constant 0 : index
    %6 = vector.load %arg2[%c2_7, %c0_8, %c0_9] : memref<5x8x128xf32, #tpu.memory_space<vmem>>, vector<1x8x128xf32>
    %7 = vector.shape_cast %6 : vector<1x8x128xf32> to vector<8x128xf32>
    %cst = arith.constant 5.000000e-01 : f32
    %8 = vector.broadcast %cst : f32 to vector<8x128xf32>
    %9 = arith.mulf %8, %3 : vector<8x128xf32>
    %10 = arith.subf %1, %9 : vector<8x128xf32>
    %cst_10 = arith.constant 5.000000e-01 : f32
    %11 = vector.broadcast %cst_10 : f32 to vector<8x128xf32>
    %12 = arith.mulf %11, %3 : vector<8x128xf32>
    %13 = arith.addf %1, %12 : vector<8x128xf32>
    %cst_11 = arith.constant 5.000000e-01 : f32
    %14 = vector.broadcast %cst_11 : f32 to vector<8x128xf32>
    %15 = arith.mulf %14, %7 : vector<8x128xf32>
    %16 = arith.subf %5, %15 : vector<8x128xf32>
    %cst_12 = arith.constant 5.000000e-01 : f32
    %17 = vector.broadcast %cst_12 : f32 to vector<8x128xf32>
    %18 = arith.mulf %17, %7 : vector<8x128xf32>
    %19 = arith.addf %5, %18 : vector<8x128xf32>
    %20 = arith.minimumf %19, %13 : vector<8x128xf32>
    %21 = arith.maximumf %16, %10 : vector<8x128xf32>
    %22 = arith.subf %20, %21 : vector<8x128xf32>
    %cst_13 = arith.constant 1.000000e+00 : f32
    %23 = vector.broadcast %cst_13 : f32 to vector<8x128xf32>
    %24 = arith.addf %22, %23 : vector<8x128xf32>
    %cst_14 = arith.constant 0.000000e+00 : f32
    %25 = vector.broadcast %cst_14 : f32 to vector<8x128xf32>
    %26 = arith.maximumf %24, %25 : vector<8x128xf32>
    %27 = arith.maximumf %19, %13 : vector<8x128xf32>
    %28 = arith.minimumf %16, %10 : vector<8x128xf32>
    %29 = arith.subf %27, %28 : vector<8x128xf32>
    %cst_15 = arith.constant 1.000000e+00 : f32
    %30 = vector.broadcast %cst_15 : f32 to vector<8x128xf32>
    %31 = arith.addf %29, %30 : vector<8x128xf32>
    %cst_16 = arith.constant 0.000000e+00 : f32
    %32 = vector.broadcast %cst_16 : f32 to vector<8x128xf32>
    %33 = arith.maximumf %31, %32 : vector<8x128xf32>
    %34 = arith.subf %13, %10 : vector<8x128xf32>
    %35 = arith.subf %19, %16 : vector<8x128xf32>
    %c1 = arith.constant 1 : index
    %c0_17 = arith.constant 0 : index
    %c0_18 = arith.constant 0 : index
    %36 = vector.load %arg1[%c1, %c0_17, %c0_18] : memref<5x8x128xf32, #tpu.memory_space<vmem>>, vector<1x8x128xf32>
    %37 = vector.shape_cast %36 : vector<1x8x128xf32> to vector<8x128xf32>
    %c3 = arith.constant 3 : index
    %c0_19 = arith.constant 0 : index
    %c0_20 = arith.constant 0 : index
    %38 = vector.load %arg1[%c3, %c0_19, %c0_20] : memref<5x8x128xf32, #tpu.memory_space<vmem>>, vector<1x8x128xf32>
    %39 = vector.shape_cast %38 : vector<1x8x128xf32> to vector<8x128xf32>
    %c1_21 = arith.constant 1 : index
    %c0_22 = arith.constant 0 : index
    %c0_23 = arith.constant 0 : index
    %40 = vector.load %arg2[%c1_21, %c0_22, %c0_23] : memref<5x8x128xf32, #tpu.memory_space<vmem>>, vector<1x8x128xf32>
    %41 = vector.shape_cast %40 : vector<1x8x128xf32> to vector<8x128xf32>
    %c3_24 = arith.constant 3 : index
    %c0_25 = arith.constant 0 : index
    %c0_26 = arith.constant 0 : index
    %42 = vector.load %arg2[%c3_24, %c0_25, %c0_26] : memref<5x8x128xf32, #tpu.memory_space<vmem>>, vector<1x8x128xf32>
    %43 = vector.shape_cast %42 : vector<1x8x128xf32> to vector<8x128xf32>
    %cst_27 = arith.constant 5.000000e-01 : f32
    %44 = vector.broadcast %cst_27 : f32 to vector<8x128xf32>
    %45 = arith.mulf %44, %39 : vector<8x128xf32>
    %46 = arith.subf %37, %45 : vector<8x128xf32>
    %cst_28 = arith.constant 5.000000e-01 : f32
    %47 = vector.broadcast %cst_28 : f32 to vector<8x128xf32>
    %48 = arith.mulf %47, %39 : vector<8x128xf32>
    %49 = arith.addf %37, %48 : vector<8x128xf32>
    %cst_29 = arith.constant 5.000000e-01 : f32
    %50 = vector.broadcast %cst_29 : f32 to vector<8x128xf32>
    %51 = arith.mulf %50, %43 : vector<8x128xf32>
    %52 = arith.subf %41, %51 : vector<8x128xf32>
    %cst_30 = arith.constant 5.000000e-01 : f32
    %53 = vector.broadcast %cst_30 : f32 to vector<8x128xf32>
    %54 = arith.mulf %53, %43 : vector<8x128xf32>
    %55 = arith.addf %41, %54 : vector<8x128xf32>
    %56 = arith.minimumf %55, %49 : vector<8x128xf32>
    %57 = arith.maximumf %52, %46 : vector<8x128xf32>
    %58 = arith.subf %56, %57 : vector<8x128xf32>
    %cst_31 = arith.constant 1.000000e+00 : f32
    %59 = vector.broadcast %cst_31 : f32 to vector<8x128xf32>
    %60 = arith.addf %58, %59 : vector<8x128xf32>
    %cst_32 = arith.constant 0.000000e+00 : f32
    %61 = vector.broadcast %cst_32 : f32 to vector<8x128xf32>
    %62 = arith.maximumf %60, %61 : vector<8x128xf32>
    %63 = arith.maximumf %55, %49 : vector<8x128xf32>
    %64 = arith.minimumf %52, %46 : vector<8x128xf32>
    %65 = arith.subf %63, %64 : vector<8x128xf32>
    %cst_33 = arith.constant 1.000000e+00 : f32
    %66 = vector.broadcast %cst_33 : f32 to vector<8x128xf32>
    %67 = arith.addf %65, %66 : vector<8x128xf32>
    %cst_34 = arith.constant 0.000000e+00 : f32
    %68 = vector.broadcast %cst_34 : f32 to vector<8x128xf32>
    %69 = arith.maximumf %67, %68 : vector<8x128xf32>
    %70 = arith.subf %49, %46 : vector<8x128xf32>
    %71 = arith.subf %55, %52 : vector<8x128xf32>
    %72 = arith.mulf %26, %62 : vector<8x128xf32>
    %73 = arith.mulf %35, %71 : vector<8x128xf32>
    %74 = arith.mulf %34, %70 : vector<8x128xf32>
    %75 = arith.addf %73, %74 : vector<8x128xf32>
    %76 = arith.subf %75, %72 : vector<8x128xf32>
    %77 = arith.mulf %33, %69 : vector<8x128xf32>
    %78 = arith.divf %72, %76 : vector<8x128xf32>
    %cst_35 = arith.constant 2.000000e+00 : f32
    %79 = vector.broadcast %cst_35 : f32 to vector<8x128xf32>
    %80 = arith.subf %79, %78 : vector<8x128xf32>
    %81 = arith.divf %76, %77 : vector<8x128xf32>
    %82 = arith.subf %80, %81 : vector<8x128xf32>
    %c4 = arith.constant 4 : index
    %c0_36 = arith.constant 0 : index
    %c0_37 = arith.constant 0 : index
    %83 = vector.load %arg1[%c4, %c0_36, %c0_37] : memref<5x8x128xf32, #tpu.memory_space<vmem>>, vector<1x8x128xf32>
    %84 = vector.shape_cast %83 : vector<1x8x128xf32> to vector<8x128xf32>
    %c4_38 = arith.constant 4 : index
    %c0_39 = arith.constant 0 : index
    %c0_40 = arith.constant 0 : index
    %85 = vector.load %arg2[%c4_38, %c0_39, %c0_40] : memref<5x8x128xf32, #tpu.memory_space<vmem>>, vector<1x8x128xf32>
    %86 = vector.shape_cast %85 : vector<1x8x128xf32> to vector<8x128xf32>
    %87 = arith.subf %84, %86 : vector<8x128xf32>
    %cst_41 = arith.constant 1.000000e-10 : f32
    %88 = vector.broadcast %cst_41 : f32 to vector<8x128xf32>
    %89 = arith.addf %87, %88 : vector<8x128xf32>
    %90 = math.cos %89 : vector<8x128xf32>
    %cst_42 = arith.constant 1.000000e+00 : f32
    %91 = vector.broadcast %cst_42 : f32 to vector<8x128xf32>
    %92 = arith.subf %91, %90 : vector<8x128xf32>
    %cst_43 = arith.constant 1.000000e+00 : f32
    %93 = vector.broadcast %cst_43 : f32 to vector<8x128xf32>
    %94 = arith.mulf %93, %92 : vector<8x128xf32>
    %cst_44 = arith.constant 1.000000e+00 : f32
    %95 = vector.broadcast %cst_44 : f32 to vector<8x128xf32>
    %96 = arith.mulf %95, %82 : vector<8x128xf32>
    %97 = arith.addf %94, %96 : vector<8x128xf32>
    %c0_45 = arith.constant 0 : index
    %c0_46 = arith.constant 0 : index
    %98 = vector.load %arg3[%c0_45, %c0_46] : memref<8x128xf32, #tpu.memory_space<vmem>>, vector<8x128xf32>
    tpu.vector_store %arg3[%c0_45, %c0_46], %97 {strides = array<i32>} : memref<8x128xf32, #tpu.memory_space<vmem>>, vector<8x128xf32>,
    return
  }
  func.func @transform_0(%arg0: i32) -> (i32, i32, i32) {
    %c0_i32 = arith.constant 0 : i32
    %c0_i32_0 = arith.constant 0 : i32
    %c0_i32_1 = arith.constant 0 : i32
    return %c0_i32, %arg0, %c0_i32_0 : i32, i32, i32
  }
  func.func @transform_1(%arg0: i32) -> (i32, i32, i32) {
    %c0_i32 = arith.constant 0 : i32
    %c0_i32_0 = arith.constant 0 : i32
    %c0_i32_1 = arith.constant 0 : i32
    return %c0_i32, %arg0, %c0_i32_0 : i32, i32, i32
  }
  func.func @transform_2(%arg0: i32) -> (i32, i32) {
    %c0_i32 = arith.constant 0 : i32
    %c0_i32_0 = arith.constant 0 : i32
    return %arg0, %c0_i32 : i32, i32
  }
}

</mosaic_0001>

<bundles_post_ra>
// kernel: tpu_custom_call.1
= control target key start
LH: loop header
LB: loop body
LE: loop exit
PB: predicated region body
PF: predicated region fallthrough
CT: control target
= control target key end

     0   :  { %7 = vsyncpa [#allocation3], 0  ;;  %s576_s0 = inlined_call_operand.hbm [shape: f32[5,8,128], index: 0, kind: input, shape index: {}]   ;;  %s577_s1 = inlined_call_operand.hbm [shape: f32[5,8,128], index: 1, kind: input, shape index: {}]   ;;  %s578_s2 = inlined_call_operand.hbm [shape: f32[8,128], index: 2, kind: output, shape index: {}]  }
   0x1   :  { %8 = vsyncpa [#allocation6], 0 }
   0x2   :  { %9 = vsyncpa [#allocation4], 0  ;;  %s14_s11 = sshll.u32 %s576_s0, 4  ;;  %s410_s12 = smov [#allocation2]   ;;  %s15_s11 = int_to_ptr.hbm [resolvable:$true] %s14_s11 }
   0x3   :  { %s16_s13 = sshll.u32 %s410_s12, 4  ;;  %s27_s16 = sshll.u32 %s577_s1, 4  ;;  %s17_s13 = int_to_ptr.vmem [resolvable:$true] %s16_s13  ;;  %s28_s16 = int_to_ptr.hbm [resolvable:$true] %s27_s16 }
   0x4   :  { %s411_s17 = smov 128   ;;  %s412_s18 = smov 8  }
   0x5   :  { %22 = dma.hbm_to_vmem [thread:$0]  %s15_s11, 640, %s17_s13, [#allocation3], %s411_s17, %s411_s17, %s412_s18  }
   0x6   :  { %s413_s19 = smov [#allocation5]  }
   0x7   :  { %s29_s20 = sshll.u32 %s413_s19, 4  ;;  %s30_s20 = int_to_ptr.vmem [resolvable:$true] %s29_s20 }
   0x8   :  { %35 = dma.hbm_to_vmem [thread:$0]  %s28_s16, 640, %s30_s20, [#allocation6], %s411_s17, %s411_s17, %s412_s18  }
   0x9   :  { %404 = dma.done.wait [#allocation3], 640  }
   0xa   :  { %405 = vsyncadd [#allocation3], 4294966656 }
   0xb   :  { %406 = dma.done.wait [#allocation6], 640  }
   0xc   :  { %407 = vsyncadd [#allocation6], 4294966656  ;;  %v133_v0 = vld [vmem:[#allocation2 + $0x20] sm:$0xff]  ;;  %v135_v1 = vld [vmem:[#allocation5 + $0x20] sm:$0xff]  ;;  %v414_v14 = vmov 683565275  }
   0xd   :  { %v136_v2 = vsub.f32 %v133_v0, %v135_v1  ;;  %v415_v17 = vmov 2475754826   ;;  %v416_v19 = vmov 2131351028   ;;  %v417_v21 = vmov 2102212464  }
   0xe   :  { %v46_v25 = vld [vmem:[#allocation2 + $0x10] sm:$0xff]  ;;  %v418_v27 = vmov 920167782   ;;  %v419_v32 = vmov 1326507024   ;;  %v49_v34 = vld [vmem:[#allocation5 + $0x10] sm:$0xff] }
   0xf   :  { %v443_v3 = vadd.f32 1e-10, %v136_v2  ;;  %v50_v38 = vmul.f32 0.5, %v46_v25  ;;  %v44_v39 = vld [vmem:[#allocation2] sm:$0xff]  ;;  %v71_v40 = vld [vmem:[#allocation2 + $0x18] sm:$0xff]  ;;  %v53_v43 = vmul.f32 0.5, %v49_v34 }
  0x10   :  { %v75_v44 = vld [vmem:[#allocation5 + $0x18] sm:$0xff]  ;;  %v47_v46 = vld [vmem:[#allocation5] sm:$0xff]  ;;  %v76_v51 = vmul.f32 0.5, %v71_v40  ;;  %v73_v62 = vld [vmem:[#allocation5 + $0x8] sm:$0xff]  ;;  %s421_s0 = smov [#allocation7]   ;;  %s302_s23 = sshll.u32 %s578_s2, 4  ;;  %s303_s23 = int_to_ptr.hbm [resolvable:$true] %s302_s23 }
  0x11   :  { %v141_v4 = vand.u32 2139095040, %v443_v3  ;;  %v138_v7 = vand.u32 2147483647, %v443_v3  ;;  %v479_v50 = vsub.f32 %v44_v39, %v50_v38  ;;  %v69_v54 = vld [vmem:[#allocation2 + $0x8] sm:$0xff]  ;;  %v79_v55 = vmul.f32 0.5, %v75_v44  ;;  %s300_s1 = sshll.u32 %s421_s0, 4  ;;  %s301_s1 = int_to_ptr.vmem [resolvable:$true] %s300_s1 }
  0x12   :  { %v488_v59 = vadd.f32 %v50_v38, %v44_v39  ;;  %v490_v60 = vsub.f32 %v47_v46, %v53_v43  ;;  %v492_v61 = vadd.f32 %v53_v43, %v47_v46  ;;  %vm140_vm12 = vcmp.lt.s32.totalorder %v443_v3, 0 }
  0x13   :  { %v142_v5 = vshrl.u32 %v141_v4, 23  ;;  %v145_v9 = vand.u32 8388607, %v138_v7  ;;  %vm548_vm13 = vcmp.le.f32.partialorder %v138_v7, 0.7853982 }
  0x15   :  { %v313_v6 = vadd.s32 4294967169, %v142_v5  ;;  %v146_v12 = vor.u32 8388608, %v145_v9  ;;  %v498_v5 = vsub.f32 %v69_v54, %v76_v51 }
  0x17   :  { %v148_v8 = vadd.s32 1, %v313_v6  ;;  %v464_v37 = vshll.u32 %v146_v12, 8  ;;  %v500_v6 = vadd.f32 %v76_v51, %v69_v54 }
  0x19   :  { %vm149_vm0 = vcmp.gt.s32.totalorder %v148_v8, 0  ;;  %v187_v48 = vand.u32 65535, %v464_v37  ;;  %v188_v49 = vshrl.u32 %v464_v37, 16 }
  0x1a   :  { %v150_v10 = vsel %vm149_vm0, %v148_v8, 0 }
  0x1b   :  { %v152_v11 = vand.u32 31, %v150_v10  ;;  %v452_v16 = vshrl.u32 %v150_v10, 5  ;;  %v502_v10 = vsub.f32 %v73_v62, %v79_v55 }
  0x1d   :  { %v449_v13 = vsub.s32 32, %v152_v11  ;;  %v155_v15 = vshll.u32 %v414_v14, %v152_v11  ;;  %v158_v18 = vshll.u32 %v415_v17, %v152_v11  ;;  %v161_v20 = vshll.u32 %v416_v19, %v152_v11 }
  0x1e   :  { %v164_v22 = vshll.u32 %v417_v21, %v152_v11  ;;  %v167_v29 = vshll.u32 %v418_v27, %v152_v11  ;;  %vm170_vm1 = vcmp.lt.s32.totalorder %v452_v16, 1  ;;  %vm172_vm2 = vcmp.lt.s32.totalorder %v452_v16, 3 }
  0x1f   :  { %v156_v23 = vshrl.u32 %v415_v17, %v449_v13  ;;  %v159_v24 = vshrl.u32 %v416_v19, %v449_v13  ;;  %v162_v26 = vshrl.u32 %v417_v21, %v449_v13  ;;  %v165_v28 = vshrl.u32 %v418_v27, %v449_v13 }
  0x20   :  { %v168_v33 = vshrl.u32 %v419_v32, %v449_v13  ;;  %vm171_vm3 = vcmp.lt.s32.totalorder %v452_v16, 2  ;;  %vm173_vm4 = vcmp.lt.s32.totalorder %v452_v16, 4  ;;  %v154_v21 = vshrl.u32 %v414_v14, %v449_v13 }
  0x21   :  { %v458_v30 = vor.u32 %v156_v23, %v155_v15  ;;  %v460_v31 = vor.u32 %v159_v24, %v158_v18  ;;  %v163_v35 = vor.u32 %v162_v26, %v161_v20  ;;  %v166_v36 = vor.u32 %v165_v28, %v164_v22 }
  0x22   :  { %v169_v41 = vor.u32 %v168_v33, %v167_v29  ;;  %v81_v20 = vadd.f32 %v79_v55, %v73_v62  ;;  %v56_v27 = vmin.f32 %v492_v61, %v488_v59  ;;  %v420_v29 = vmov 0  }
  0x23   :  { %v178_v42 = vsel %vm170_vm1, %v458_v30, %v460_v31  ;;  %v179_v45 = vsel %vm173_vm4, %v166_v36, 920167782  ;;  %v182_v53 = vsel %vm170_vm1, %v460_v31, %v163_v35  ;;  %v175_v23 = vsel %vm173_vm4, %v163_v35, 2102212464 }
  0x24   :  { %v180_v47 = vsel %vm172_vm2, %v163_v35, %v179_v45  ;;  %v183_v56 = vsel %vm173_vm4, %v169_v41, 1326507024  ;;  %v174_v13 = vsel %vm170_vm1, %v154_v21, %v458_v30  ;;  %v176_v14 = vsel %vm172_vm2, %v460_v31, %v175_v23 }
  0x25   :  { %v181_v52 = vsel %vm171_vm3, %v178_v42, %v180_v47  ;;  %v184_v63 = vsel %vm172_vm2, %v166_v36, %v183_v56  ;;  %v57_v42 = vmax.f32 %v490_v60, %v479_v50  ;;  %v82_v43 = vmin.f32 %v81_v20, %v500_v6 }
  0x26   :  { %v211_v57 = vand.u32 65535, %v181_v52  ;;  %v212_v58 = vshrl.u32 %v181_v52, 16  ;;  %v185_v0 = vsel %vm171_vm3, %v182_v53, %v184_v63  ;;  %v83_v44 = vmax.f32 %v502_v10, %v498_v5 }
  0x27   :  { %v189_v8 = vand.u32 65535, %v185_v0  ;;  %v190_v9 = vshrl.u32 %v185_v0, 16  ;;  %v177_v31 = vsel %vm171_vm3, %v174_v13, %v176_v14  ;;  %v58_v52 = vsub.f32 %v56_v27, %v57_v42 }
  0x28   :  { %v213_v1 = vmul.u32 %v211_v57, %v187_v48  ;;  %v214_v2 = vmul.u32 %v212_v58, %v187_v48  ;;  %v215_v4 = vmul.u32 %v211_v57, %v188_v49  ;;  %v216_v19 = vmul.u32 %v212_v58, %v188_v49 }
  0x29   :  { %v191_v15 = vmul.u32 %v189_v8, %v187_v48  ;;  %v192_v17 = vmul.u32 %v190_v9, %v187_v48  ;;  %v193_v18 = vmul.u32 %v189_v8, %v188_v49  ;;  %v194_v24 = vmul.u32 %v190_v9, %v188_v49 }
  0x2a   :  { %v217_v11 = vshll.u32 %v214_v2, 16  ;;  %v219_v12 = vshll.u32 %v215_v4, 16  ;;  %v218_v28 = vshrl.u32 %v214_v2, 16  ;;  %v220_v38 = vshrl.u32 %v215_v4, 16 }
  0x2b   :  { %v195_v25 = vshll.u32 %v192_v17, 16  ;;  %v197_v26 = vshll.u32 %v193_v18, 16  ;;  %v196_v39 = vshrl.u32 %v192_v17, 16  ;;  %v198_v30 = vshrl.u32 %v193_v18, 16 }
  0x2c   :  { %vm221_vm5 = vc.u32 %v213_v1, %v217_v11  ;;  %v223_v22 = vadd.s32 %v217_v11, %v213_v1  ;;  %v84_v53 = vsub.f32 %v82_v43, %v83_v44  ;;  %v231_v55 = vmul.u32 %v464_v37, %v177_v31 }
  0x2d   :  { %v222_v32 = vsel %vm221_vm5, 1, %v420_v29  ;;  %vm199_vm7 = vc.u32 %v191_v15, %v195_v25  ;;  %v201_v33 = vadd.s32 %v195_v25, %v191_v15  ;;  %v61_v57 = vmax.f32 %v492_v61, %v488_v59 }
  0x2e   :  { %vm225_vm6 = vc.u32 %v223_v22, %v219_v12  ;;  %v224_v34 = vadd.s32 %v222_v32, %v216_v19  ;;  %v200_v35 = vsel %vm199_vm7, 1, %v420_v29  ;;  %v227_v49 = vadd.s32 %v223_v22, %v219_v12 }
  0x2f   :  { %v226_v36 = vsel %vm225_vm6, 1, %v420_v29  ;;  %v202_v40 = vadd.s32 %v200_v35, %v194_v24  ;;  %vm203_vm8 = vc.u32 %v201_v33, %v197_v26  ;;  %v62_v58 = vmin.f32 %v490_v60, %v479_v50 }
  0x30   :  { %v228_v41 = vadd.s32 %v226_v36, %v224_v34  ;;  %v204_v45 = vsel %vm203_vm8, 1, %v420_v29  ;;  %v66_v62 = vsub.f32 %v488_v59, %v479_v50  ;;  %v67_v16 = vsub.f32 %v492_v61, %v490_v60 }
  0x31   :  { %v206_v46 = vadd.s32 %v204_v45, %v202_v40  ;;  %v87_v63 = vmax.f32 %v81_v20, %v500_v6  ;;  %v88_v0 = vmin.f32 %v502_v10, %v498_v5  ;;  %v92_v37 = vsub.f32 %v500_v6, %v498_v5 }
  0x32   :  { %v229_v47 = vadd.s32 %v228_v41, %v218_v28  ;;  %v59_v1 = vadd.f32 1.0, %v58_v52  ;;  %v85_v2 = vadd.f32 1.0, %v84_v53  ;;  %v93_v4 = vsub.f32 %v81_v20, %v502_v10 }
  0x33   :  { %v207_v48 = vadd.s32 %v206_v46, %v196_v39  ;;  %v63_v11 = vsub.f32 %v61_v57, %v62_v58  ;;  %v89_v50 = vsub.f32 %v87_v63, %v88_v0  ;;  %v96_v15 = vmul.f32 %v92_v37, %v66_v62 }
  0x34   :  { %v230_v51 = vadd.s32 %v229_v47, %v220_v38  ;;  %v60_v12 = vmax.f32 %v59_v1, 0.0  ;;  %v86_v60 = vmax.f32 %v85_v2, 0.0  ;;  %v95_v61 = vmul.f32 %v93_v4, %v67_v16 }
  0x35   :  { %v208_v54 = vadd.s32 %v207_v48, %v198_v30  ;;  %v64_v19 = vadd.f32 1.0, %v63_v11  ;;  %v90_v21 = vadd.f32 1.0, %v89_v50 }
  0x36   :  { %v234_v56 = vadd.s32 1, %v230_v51  ;;  %v538_v22 = vmul.f32 %v86_v60, %v60_v12  ;;  %v97_v5 = vadd.f32 %v96_v15, %v95_v61 }
  0x37   :  { %vm233_vm9 = vc.u32 %v208_v54, %v227_v49  ;;  %v65_v10 = vmax.f32 %v64_v19, 0.0  ;;  %v91_v20 = vmax.f32 %v90_v21, 0.0  ;;  %v232_v29 = vadd.s32 %v227_v49, %v208_v54 }
  0x38   :  { %v235_v8 = vsel %vm233_vm9, %v234_v56, %v230_v51  ;;  %v541_v24 = vsub.f32 %v97_v5, %v538_v22  ;;  %vm281_vm9 = vweird.f32 %v443_v3 }
  0x39   :  { %v236_v9 = vadd.s32 %v235_v8, %v231_v55  ;;  %v99_v27 = vmul.f32 %v91_v20, %v65_v10 }
  0x3a   :  { %328 = vrcp.f32 %v541_v24  ;;  %vm105_vm14 = vweird.f32 %v541_v24  ;;  %v111_v54 = vand.u32 2147483648, %v541_v24  ;;  %v109_v56 = vand.u32 2147483647, %v541_v24 }
  0x3b   :  { %v237_v59 = vadd.s32 536870912, %v236_v9  ;;  %330 = vrcp.f32 %v99_v27  ;;  %vm121_vm1 = vweird.f32 %v99_v27  ;;  %v127_v37 = vand.u32 2147483648, %v99_v27 }
  0x3c   :  { %v112_v0 = vor.u32 1.1754944e-38, %v111_v54  ;;  %vm110_vm3 = vcmp.eq.f32.partialorder %v109_v56, 8.507059e+37 }
  0x3d   :  { %v238_v17 = vshrl.u32 %v237_v59, 30  ;;  %v128_v60 = vor.u32 1.1754944e-38, %v127_v37 }
  0x3f   :  { %v239_v18 = vshll.u32 %v238_v17, 30  ;;  %v262_v52 = vsub.s32 4, %v238_v17 }
  0x40   :  { %v329_v13 = vpop.eup %328 }
  0x41   :  { %v240_v6 = vsub.s32 %v236_v9, %v239_v18  ;;  %v101_v40 = vmul.f32 %v329_v13, %v541_v24  ;;  %v331_v41 = vpop.eup %330  ;;  %vm106_vm15 = vweird.f32 %v329_v13  ;;  %v263_v63 = vsel %vm140_vm12, %v262_v52, %v238_v17 }
  0x42   :  { %v117_v30 = vmul.f32 %v331_v41, %v99_v27  ;;  %vm560_vm0 = vmor %vm105_vm14, %vm106_vm15  ;;  %vm122_vm2 = vweird.f32 %v331_v41  ;;  %v125_v9 = vand.u32 2147483647, %v99_v27  ;;  %v265_v11 = vsel %vm548_vm13, 0, %v263_v63 }
  0x43   :  { %vm241_vm10 = vcmp.lt.s32.totalorder %v240_v6, 0  ;;  %v242_v23 = vsub.s32 0, %v240_v6  ;;  %v102_v45 = vsub.f32 1.0, %v101_v40  ;;  %vm123_vm4 = vmor %vm121_vm1, %vm122_vm2  ;;  %v282_v18 = vand.u32 3, %v265_v11 }
  0x44   :  { %v118_v49 = vsub.f32 1.0, %v117_v30  ;;  %vm126_vm5 = vcmp.eq.f32.partialorder %v125_v9, 8.507059e+37 }
  0x45   :  { %v243_v25 = vsel %vm241_vm10, %v242_v23, %v240_v6  ;;  %v103_v48 = vmul.f32 %v329_v13, %v102_v45  ;;  %vm287_vm6 = vcmp.eq.s32.totalorder %v282_v18, 2  ;;  %vm284_vm7 = vcmp.eq.s32.totalorder %v282_v18, 0 }
  0x46   :  { %v244_v26 = vclz %v243_v25  ;;  %v119_v57 = vmul.f32 %v331_v41, %v118_v49  ;;  %vm283_vm8 = vcmp.lt.s32.totalorder %v282_v18, 2 }
  0x47   :  { %v104_v55 = vadd.f32 %v329_v13, %v103_v48 }
  0x48   :  { %v314_v28 = vadd.s32 4294967294, %v244_v26  ;;  %v120_v8 = vadd.f32 %v331_v41, %v119_v57 }
  0x49   :  { %v108_v4 = vsel %vm560_vm0, %v329_v13, %v104_v55 }
  0x4a   :  { %vm315_vm11 = vcmp.lt.s32.totalorder %v314_v28, 0  ;;  %v113_v12 = vsel %vm110_vm3, %v112_v0, %v108_v4  ;;  %v124_v17 = vsel %vm123_vm4, %v331_v41, %v120_v8 }
  0x4b   :  { %v247_v32 = vsel %vm315_vm11, 0, %v314_v28  ;;  %v114_v5 = vmul.f32 %v113_v12, %v538_v22 }
  0x4c   :  { %v248_v33 = vsub.s32 32, %v247_v32  ;;  %v249_v34 = vshll.u32 %v240_v6, %v247_v32  ;;  %v252_v36 = vsub.s32 4294967266, %v247_v32  ;;  %v129_v6 = vsel %vm126_vm5, %v128_v60, %v124_v17 }
  0x4d   :  { %v115_v26 = vsub.f32 2.0, %v114_v5  ;;  %v130_v27 = vmul.f32 %v129_v6, %v541_v24 }
  0x4e   :  { %v250_v14 = vshrl.u32 %v232_v29, %v248_v33  ;;  %v253_v35 = vadd.s32 127, %v252_v36 }
  0x4f   :  { %v131_v33 = vsub.f32 %v115_v26, %v130_v27 }
  0x50   :  { %v251_v38 = vor.u32 %v250_v14, %v249_v34  ;;  %v254_v39 = vshll.u32 %v253_v35, 23 }
  0x52   :  { %v255_v42 = vor.u32 4788187, %v254_v39  ;;  %v258_v43 = vcvt.s32.f32 %v251_v38 }
  0x54   :  { %v256_v44 = vand.u32 2147483647, %v255_v42 }
  0x56   :  { %v259_v46 = vmul.f32 %v258_v43, %v256_v44 }
  0x58   :  { %v260_v31 = vxor.u32 2147483648, %v259_v46 }
  0x5a   :  { %v261_v51 = vsel %vm140_vm12, %v260_v31, %v259_v46 }
  0x5b   :  { %v264_v53 = vsel %vm548_vm13, %v443_v3, %v261_v51 }
  0x5c   :  { %v266_v7 = vmul.f32 %v264_v53, %v264_v53 }
  0x5e   :  { %v267_v62 = vmul.f32 -0.001358992, %v266_v7  ;;  %v274_v16 = vmul.f32 -0.00019511016, %v266_v7 }
  0x60   :  { %v268_v1 = vadd.f32 0.041655596, %v267_v62  ;;  %v275_v2 = vadd.f32 0.008332121, %v274_v16 }
  0x62   :  { %v269_v50 = vmul.f32 %v268_v1, %v266_v7  ;;  %v276_v59 = vmul.f32 %v275_v2, %v266_v7 }
  0x64   :  { %v270_v61 = vadd.f32 -0.4999988, %v269_v50  ;;  %v277_v15 = vadd.f32 -0.16666654, %v276_v59 }
  0x66   :  { %v271_v19 = vmul.f32 %v270_v61, %v266_v7  ;;  %v278_v21 = vmul.f32 %v277_v15, %v266_v7 }
  0x68   :  { %v272_v23 = vadd.f32 1.0, %v271_v19  ;;  %v279_v10 = vadd.f32 1.0, %v278_v21 }
  0x6a   :  { %v280_v20 = vmul.f32 %v279_v10, %v264_v53  ;;  %v288_v25 = vxor.u32 2147483648, %v272_v23 }
  0x6c   :  { %v285_v28 = vxor.u32 2147483648, %v280_v20  ;;  %v289_v29 = vsel %vm287_vm6, %v288_v25, %v280_v20 }
  0x6e   :  { %v286_v32 = vsel %vm284_vm7, %v272_v23, %v285_v28 }
  0x6f   :  { %v290_v34 = vsel %vm283_vm8, %v286_v32, %v289_v29 }
  0x70   :  { %v291_v36 = vsel %vm281_vm9, nan, %v290_v34 }
  0x71   :  { %v292_v22 = vsub.f32 1.0, %v291_v36 }
  0x73   :  { %v293_v13 = vadd.f32 %v292_v22, %v131_v33 }
  0x75   :  { %294 = vst [vmem:[#allocation7] sm:$0xff] %v293_v13 }
  0x76   :  { %305 = dma.vmem_to_hbm [thread:$0]  %s301_s1, 128, %s303_s23, [#allocation4]  }
  0x77   :  { %408 = dma.done.wait [#allocation4], 128  }
  0x78   :  { %409 = vsyncadd [#allocation4], 4294967168 }
  0x79   :  { %310 = vsyncpa [#allocation3], 1 }
  0x7a   :  { %311 = vsyncpa [#allocation6], 1 }
  0x7b   :  { %312 = vsyncpa [#allocation4], 1 }

</bundles_post_ra>
